<compile_context>
chip_gen: v5e
topology: v5e:2x2
jax: 0.10.0
libtpu: 0.0.40
codegen_flags: <defaults>
</compile_context>

<pallas_src>
import functools

import numpy as np
import jax
import jax.numpy as jnp
from jax.experimental import pallas as pl
from jax.experimental.pallas import tpu as pltpu

CRITIC_FCS1_UNITS = 400
CRITIC_FC2_UNITS = 300
BN_EPS = 1e-5


def _critic_kernel(state_ref, action_ref, w1s_ref, w2_ref,
                   side1_ref, side2_ref, b3_ref, out_ref, *, action_size):
    # side1 rows: [b1, gamma, beta, w1a_0 .. w1a_{A-1}]   (f32, one DMA)
    b1 = side1_ref[0:1, :]
    gamma = side1_ref[1:2, :]
    beta = side1_ref[2:3, :]

    # ---- fcs1: state half on the MXU; action half (K = action_size, tiny) as
    #      broadcast FMAs on the VPU — avoids a mostly-empty second MXU pass.
    s = state_ref[...].astype(w1s_ref.dtype)                    # (B, state_dim)
    h1 = jnp.dot(s, w1s_ref[...],
                 preferred_element_type=jnp.float32) + b1       # (B, 400) f32
    a = action_ref[...]                                         # (B, A) f32
    for j in range(action_size):                                # unrolled, A tiny
        h1 = h1 + a[:, j:j + 1] * side1_ref[3 + j:4 + j, :]
    h1 = jnp.maximum(h1, 0.0)

    # ---- BatchNorm1d (training-mode batch stats), folded scale/shift, f32 ----
    inv_n = 1.0 / h1.shape[0]
    mean = jnp.sum(h1, axis=0, keepdims=True) * inv_n            # (1, 400)
    mean_sq = jnp.sum(h1 * h1, axis=0, keepdims=True) * inv_n    # (1, 400)
    var = mean_sq - mean * mean                                  # biased variance
    inv_std = jax.lax.rsqrt(var + BN_EPS)
    scale = gamma * inv_std
    shift = beta - mean * scale
    h1 = h1 * scale + shift                                      # 2 VPU ops/elem

    # ---- fc2 + ReLU ----
    b2 = side2_ref[0:1, :]
    w3 = side2_ref[1:2, :]
    h2 = jnp.dot(h1.astype(w2_ref.dtype), w2_ref[...],
                 preferred_element_type=jnp.float32) + b2        # (B, 300) f32
    h2 = jnp.maximum(h2, 0.0)

    # ---- fc3 (out_features = 1): VPU multiply + XLU lane-reduce; store the
    #      result lane-dense as (1, B) (batch on lanes) instead of (B, 1).
    q = jnp.sum(h2 * w3, axis=1) + b3_ref[0]                     # (B,)
    out_ref[...] = q.reshape(1, -1).astype(out_ref.dtype)        # (1, B)


def critic_forward(state, action, params):
    """Critic forward pass in one gridless Pallas call.

    Weights are DMA'd once per call and stay VMEM-resident for the whole batch;
    the batch dimension is amortized inside the single kernel invocation.
    """
    B = state.shape[0]
    action = action.astype(jnp.float32)                          # mirrors action.float()
    action_size = action.shape[1]

    vmem = pl.BlockSpec(memory_space=pltpu.MemorySpace.VMEM)
    smem = pl.BlockSpec(memory_space=pltpu.MemorySpace.SMEM)

    kernel = functools.partial(_critic_kernel, action_size=action_size)

    q_row = pl.pallas_call(
        kernel,
        out_shape=jax.ShapeDtypeStruct((1, B), jnp.float32),
        in_specs=[vmem, vmem, vmem, vmem, vmem, vmem, smem],
        out_specs=vmem,
    )(state, action,
      params["w1s"], params["w2"],
      params["side1"], params["side2"], params["b3"])

    return q_row.reshape(B, 1)                                   # free reshape


def init_critic_params(key, input_dim, action_size,
                       fcs1_units=CRITIC_FCS1_UNITS, fc2_units=CRITIC_FC2_UNITS,
                       weight_dtype=jnp.float32):
    """Init mimicking the PyTorch module's reset_parameters().

    hidden_init() in the reference uses weight.size()[0] (== out_features), so
    lim = 1/sqrt(out_features) for fcs1 and fc2; fc3 uses +/-0.003.  Biases use
    the default nn.Linear init lim = 1/sqrt(in_features).
    """
    d_in = input_dim + action_size
    k1, k2, k3, k4, k5, k6 = jax.random.split(key, 6)

    lim1 = 1.0 / np.sqrt(fcs1_units)
    lim2 = 1.0 / np.sqrt(fc2_units)
    lim3 = 0.003

    w1_full = jax.random.uniform(k1, (d_in, fcs1_units), jnp.float32, -lim1, lim1)
    b1 = jax.random.uniform(k4, (1, fcs1_units), jnp.float32,
                            -1.0 / np.sqrt(d_in), 1.0 / np.sqrt(d_in))
    w2 = jax.random.uniform(k2, (fcs1_units, fc2_units), jnp.float32, -lim2, lim2)
    b2 = jax.random.uniform(k5, (1, fc2_units), jnp.float32,
                            -1.0 / np.sqrt(fcs1_units), 1.0 / np.sqrt(fcs1_units))
    w3 = jax.random.uniform(k3, (1, fc2_units), jnp.float32, -lim3, lim3)
    b3 = jax.random.uniform(k6, (1,), jnp.float32,
                            -1.0 / np.sqrt(fc2_units), 1.0 / np.sqrt(fc2_units))

    gamma = jnp.ones((1, fcs1_units), jnp.float32)
    beta = jnp.zeros((1, fcs1_units), jnp.float32)

    return {
        # large matmul weights, stored (in, out); optionally bf16 for halved DMA
        "w1s": w1_full[:input_dim, :].astype(weight_dtype),
        "w2": w2.astype(weight_dtype),
        # coalesced f32 side inputs
        "side1": jnp.concatenate([b1, gamma, beta, w1_full[input_dim:, :]], axis=0),
        "side2": jnp.concatenate([b2, w3], axis=0),
        # scalar bias, lives in SMEM
        "b3": b3,
    }


def _critic_reference(state, action, params):
    """Pure-JAX reference (same math, same param layout) for a sanity check."""
    side1, side2 = params["side1"], params["side2"]
    b1, gamma, beta, w1a = side1[0:1], side1[1:2], side1[2:3], side1[3:]
    b2, w3 = side2[0:1], side2[1:2]
    w1s = params["w1s"].astype(jnp.float32)
    w2 = params["w2"].astype(jnp.float32)

    h1 = jax.nn.relu(state @ w1s + action @ w1a + b1)
    mean = h1.mean(axis=0, keepdims=True)
    var = ((h1 - mean) ** 2).mean(axis=0, keepdims=True)
    h1 = (h1 - mean) * jax.lax.rsqrt(var + BN_EPS) * gamma + beta
    h2 = jax.nn.relu(h1 @ w2 + b2)
    return h2 @ w3.T + params["b3"][0]


if __name__ == "__main__":
    key = jax.random.PRNGKey(0)
    k_params, k_state, k_action = jax.random.split(key, 3)

    batch = 8           # small demo batch (>1 required for BatchNorm batch stats)
    input_dim = 24      # state dimension (Tennis env)
    action_size = 2     # action dimension

    params = init_critic_params(k_params, input_dim, action_size)

    state = jax.random.normal(k_state, (batch, input_dim), jnp.float32)
    action = jax.random.uniform(k_action, (batch, action_size), jnp.float32, -1.0, 1.0)

    q = critic_forward(state, action, params)
    jax.block_until_ready(q)

    assert q.shape == (batch, 1) and q.dtype == jnp.float32
    assert bool(jnp.all(jnp.isfinite(q)))

    q_ref = _critic_reference(state, action, params)
    assert np.allclose(np.asarray(q), np.asarray(q_ref), rtol=2e-3, atol=2e-3)

    print("KERNEL_OK")
</pallas_src>

<mosaic_0001>
module attributes {stable_mosaic.version = 11 : i64} {
  func.func @_critic_kernel(%arg0: memref<8x24xf32, #tpu.memory_space<vmem>>, %arg1: memref<8x2xf32, #tpu.memory_space<vmem>>, %arg2: memref<24x400xf32, #tpu.memory_space<vmem>>, %arg3: memref<400x300xf32, #tpu.memory_space<vmem>>, %arg4: memref<5x400xf32, #tpu.memory_space<vmem>>, %arg5: memref<2x300xf32, #tpu.memory_space<vmem>>, %arg6: memref<1xf32, #tpu.memory_space<smem>>, %arg7: memref<1x8xf32, #tpu.memory_space<vmem>>) attributes {dimension_semantics = [], scalar_prefetch = 0 : i64, scratch_operands = 0 : i64, tpu.core_type = #tpu.core_type<tc>} {
    %c0 = arith.constant 0 : index
    %c0_0 = arith.constant 0 : index
    %0 = vector.load %arg4[%c0, %c0_0] : memref<5x400xf32, #tpu.memory_space<vmem>>, vector<1x400xf32>
    %c1 = arith.constant 1 : index
    %c0_1 = arith.constant 0 : index
    %1 = vector.load %arg4[%c1, %c0_1] : memref<5x400xf32, #tpu.memory_space<vmem>>, vector<1x400xf32>
    %c2 = arith.constant 2 : index
    %c0_2 = arith.constant 0 : index
    %2 = vector.load %arg4[%c2, %c0_2] : memref<5x400xf32, #tpu.memory_space<vmem>>, vector<1x400xf32>
    %c0_3 = arith.constant 0 : index
    %c0_4 = arith.constant 0 : index
    %3 = vector.load %arg0[%c0_3, %c0_4] : memref<8x24xf32, #tpu.memory_space<vmem>>, vector<8x24xf32>
    %c0_5 = arith.constant 0 : index
    %c0_6 = arith.constant 0 : index
    %4 = vector.load %arg2[%c0_5, %c0_6] : memref<24x400xf32, #tpu.memory_space<vmem>>, vector<24x400xf32>
    %cst = arith.constant dense<0.000000e+00> : vector<8x400xf32>
    %5 = tpu.matmul %3, %4, %cst {dimension_numbers = #tpu.dot_dimension_numbers<[1], [0], [0], [1], [0, 0, 1, 1], [], []>} : vector<8x24xf32>, vector<24x400xf32>, vector<8x400xf32> -> vector<8x400xf32>
    %6 = vector.broadcast %0 : vector<1x400xf32> to vector<8x400xf32>
    %7 = arith.addf %5, %6 : vector<8x400xf32>
    %c0_7 = arith.constant 0 : index
    %c0_8 = arith.constant 0 : index
    %8 = vector.load %arg1[%c0_7, %c0_8] : memref<8x2xf32, #tpu.memory_space<vmem>>, vector<8x2xf32>
    %9 = vector.extract_strided_slice %8 {offsets = [0, 0], sizes = [8, 1], strides = [1, 1]} : vector<8x2xf32> to vector<8x1xf32>
    %c3 = arith.constant 3 : index
    %c0_9 = arith.constant 0 : index
    %10 = vector.load %arg4[%c3, %c0_9] : memref<5x400xf32, #tpu.memory_space<vmem>>, vector<1x400xf32>
    %11 = vector.broadcast %9 : vector<8x1xf32> to vector<8x400xf32>
    %12 = vector.broadcast %10 : vector<1x400xf32> to vector<8x400xf32>
    %13 = arith.mulf %11, %12 : vector<8x400xf32>
    %14 = arith.addf %7, %13 : vector<8x400xf32>
    %15 = vector.extract_strided_slice %8 {offsets = [0, 1], sizes = [8, 1], strides = [1, 1]} : vector<8x2xf32> to vector<8x1xf32>
    %c4 = arith.constant 4 : index
    %c0_10 = arith.constant 0 : index
    %16 = vector.load %arg4[%c4, %c0_10] : memref<5x400xf32, #tpu.memory_space<vmem>>, vector<1x400xf32>
    %17 = vector.broadcast %15 : vector<8x1xf32> to vector<8x400xf32>
    %18 = vector.broadcast %16 : vector<1x400xf32> to vector<8x400xf32>
    %19 = arith.mulf %17, %18 : vector<8x400xf32>
    %20 = arith.addf %14, %19 : vector<8x400xf32>
    %cst_11 = arith.constant 0.000000e+00 : f32
    %21 = vector.broadcast %cst_11 : f32 to vector<8x400xf32>
    %22 = arith.maximumf %20, %21 : vector<8x400xf32>
    %cst_12 = arith.constant dense<0.000000e+00> : vector<400xf32>
    %23 = vector.multi_reduction <add>, %22, %cst_12 [0] : vector<8x400xf32> to vector<400xf32>
    %24 = vector.shape_cast %23 : vector<400xf32> to vector<1x400xf32>
    %cst_13 = arith.constant 1.250000e-01 : f32
    %25 = vector.broadcast %cst_13 : f32 to vector<1x400xf32>
    %26 = arith.mulf %24, %25 : vector<1x400xf32>
    %27 = arith.mulf %22, %22 : vector<8x400xf32>
    %cst_14 = arith.constant dense<0.000000e+00> : vector<400xf32>
    %28 = vector.multi_reduction <add>, %27, %cst_14 [0] : vector<8x400xf32> to vector<400xf32>
    %29 = vector.shape_cast %28 : vector<400xf32> to vector<1x400xf32>
    %cst_15 = arith.constant 1.250000e-01 : f32
    %30 = vector.broadcast %cst_15 : f32 to vector<1x400xf32>
    %31 = arith.mulf %29, %30 : vector<1x400xf32>
    %32 = arith.mulf %26, %26 : vector<1x400xf32>
    %33 = arith.subf %31, %32 : vector<1x400xf32>
    %cst_16 = arith.constant 9.99999974E-6 : f32
    %34 = vector.broadcast %cst_16 : f32 to vector<1x400xf32>
    %35 = arith.addf %33, %34 : vector<1x400xf32>
    %36 = math.rsqrt %35 : vector<1x400xf32>
    %37 = arith.mulf %1, %36 : vector<1x400xf32>
    %38 = arith.mulf %26, %37 : vector<1x400xf32>
    %39 = arith.subf %2, %38 : vector<1x400xf32>
    %40 = vector.broadcast %37 : vector<1x400xf32> to vector<8x400xf32>
    %41 = arith.mulf %22, %40 : vector<8x400xf32>
    %42 = vector.broadcast %39 : vector<1x400xf32> to vector<8x400xf32>
    %43 = arith.addf %41, %42 : vector<8x400xf32>
    %c0_17 = arith.constant 0 : index
    %c0_18 = arith.constant 0 : index
    %44 = vector.load %arg5[%c0_17, %c0_18] : memref<2x300xf32, #tpu.memory_space<vmem>>, vector<1x300xf32>
    %c1_19 = arith.constant 1 : index
    %c0_20 = arith.constant 0 : index
    %45 = vector.load %arg5[%c1_19, %c0_20] : memref<2x300xf32, #tpu.memory_space<vmem>>, vector<1x300xf32>
    %c0_21 = arith.constant 0 : index
    %c0_22 = arith.constant 0 : index
    %46 = vector.load %arg3[%c0_21, %c0_22] : memref<400x300xf32, #tpu.memory_space<vmem>>, vector<400x300xf32>
    %cst_23 = arith.constant dense<0.000000e+00> : vector<8x300xf32>
    %47 = tpu.matmul %43, %46, %cst_23 {dimension_numbers = #tpu.dot_dimension_numbers<[1], [0], [0], [1], [0, 0, 1, 1], [], []>} : vector<8x400xf32>, vector<400x300xf32>, vector<8x300xf32> -> vector<8x300xf32>
    %48 = vector.broadcast %44 : vector<1x300xf32> to vector<8x300xf32>
    %49 = arith.addf %47, %48 : vector<8x300xf32>
    %cst_24 = arith.constant 0.000000e+00 : f32
    %50 = vector.broadcast %cst_24 : f32 to vector<8x300xf32>
    %51 = arith.maximumf %49, %50 : vector<8x300xf32>
    %52 = vector.broadcast %45 : vector<1x300xf32> to vector<8x300xf32>
    %53 = arith.mulf %51, %52 : vector<8x300xf32>
    %cst_25 = arith.constant dense<0.000000e+00> : vector<8xf32>
    %54 = vector.multi_reduction <add>, %53, %cst_25 [1] : vector<8x300xf32> to vector<8xf32>
    %c0_26 = arith.constant 0 : index
    %55 = memref.load %arg6[%c0_26] : memref<1xf32, #tpu.memory_space<smem>>
    %56 = vector.broadcast %55 : f32 to vector<8xf32>
    %57 = arith.addf %54, %56 : vector<8xf32>
    %58 = vector.shape_cast %57 : vector<8xf32> to vector<1x8xf32>
    %c0_27 = arith.constant 0 : index
    %c0_28 = arith.constant 0 : index
    %59 = vector.load %arg7[%c0_27, %c0_28] : memref<1x8xf32, #tpu.memory_space<vmem>>, vector<1x8xf32>
    tpu.vector_store %arg7[%c0_27, %c0_28], %58 {strides = array<i32>} : memref<1x8xf32, #tpu.memory_space<vmem>>, vector<1x8xf32>,
    return
  }
}

</mosaic_0001>

<bundles_post_ra>
// kernel: tpu_custom_call.1
= control target key start
LH: loop header
LB: loop body
LE: loop exit
PB: predicated region body
PF: predicated region fallthrough
CT: control target
= control target key end

     0   :  { %13 = vsyncpa [#allocation4], 0  ;;  %s1219_s0 = inlined_call_operand.vmem [shape: f32[8,24], index: 0, kind: input, shape index: {}]   ;;  %s1220_s1 = inlined_call_operand.vmem [shape: f32[8,2], index: 1, kind: input, shape index: {}]   ;;  %s1221_s2 = inlined_call_operand.hbm [shape: f32[24,400], index: 2, kind: input, shape index: {}]   ;;  %s1222_s3 = inlined_call_operand.hbm [shape: f32[400,300], index: 3, kind: input, shape index: {}]   ;;  %s1223_s4 = inlined_call_operand.hbm [shape: f32[5,400], index: 4, kind: input, shape index: {}]   ;;  %s1224_s5 = inlined_call_operand.hbm [shape: f32[2,300], index: 5, kind: input, shape index: {}]   ;;  %s1225_s6 = inlined_call_operand.<no memory space> [shape: f32[1], index: 6, kind: input, shape index: {}]   ;;  %s1226_s7 = inlined_call_operand.hbm [shape: f32[1,8], index: 7, kind: output, shape index: {}]  }
   0x1   :  { %14 = vsyncpa [#allocation7], 0 }
   0x2   :  { %15 = vsyncpa [#allocation10], 0  ;;  %s38_s26 = sshll.u32 %s1222_s3, 4  ;;  %s39_s26 = int_to_ptr.hbm [resolvable:$true] %s38_s26 }
   0x3   :  { %16 = vsyncpa [#allocation5], 0  ;;  %s1029_s27 = smov [#allocation6]   ;;  %s25_s8 = sshll.u32 %s1221_s2, 4  ;;  %s26_s8 = int_to_ptr.hbm [resolvable:$true] %s25_s8 }
   0x4   :  { %s40_s28 = sshll.u32 %s1029_s27, 4  ;;  %s1030_s9 = smov 384   ;;  %s41_s28 = int_to_ptr.vmem [resolvable:$true] %s40_s28 }
   0x5   :  { %s1031_s10 = smov 24   ;;  %s1032_s11 = smov [#allocation3]  }
   0x6   :  { %46 = dma.hbm_to_vmem [thread:$0]  %s39_s26, 19200, %s41_s28, [#allocation7], %s1030_s9, %s1030_s9, %s1031_s10  }
   0x7   :  { %s27_s12 = sshll.u32 %s1032_s11, 4  ;;  %s1033_s13 = smov 512   ;;  %s28_s12 = int_to_ptr.vmem [resolvable:$true] %s27_s12 }
   0x8   :  { %s1034_s14 = smov 32   ;;  %s52_s16 = sshll.u32 %s1223_s4, 4  ;;  %s53_s16 = int_to_ptr.hbm [resolvable:$true] %s52_s16 }
   0x9   :  { %33 = dma.hbm_to_vmem [thread:$0]  %s26_s8, 1536, %s28_s12, [#allocation4], %s1033_s13, %s1033_s13, %s1034_s14  }
   0xa   :  { %s1035_s17 = smov [#allocation8]   ;;  %s63_s20 = sshll.u32 %s1224_s5, 4  ;;  %s64_s20 = int_to_ptr.hbm [resolvable:$true] %s63_s20 }
   0xb   :  { %s54_s18 = sshll.u32 %s1035_s17, 4  ;;  %s1036_s21 = smov [#allocation9]   ;;  %s55_s18 = int_to_ptr.vmem [resolvable:$true] %s54_s18 }
   0xc   :  { %57 = dma.hbm_to_vmem [thread:$0]  %s53_s16, 512, %s55_s18, [#allocation7]  }
   0xd   :  { %s65_s22 = sshll.u32 %s1036_s21, 4  ;;  %s66_s22 = int_to_ptr.vmem [resolvable:$true] %s65_s22 }
   0xe   :  { %68 = dma.hbm_to_vmem [thread:$0]  %s64_s20, 96, %s66_s22, [#allocation10]  }
   0xf   :  { %1021 = dma.done.wait [#allocation4], 1536  }
  0x10   :  { %1022 = vsyncadd [#allocation4], 4294965760 }
  0x11   :  { %1023 = dma.done.wait [#allocation7], 19712  }
  0x12   :  { %1024 = vsyncadd [#allocation7], 4294947584 }
  0x13   :  { %1025 = dma.done.wait [#allocation10], 96  }
  0x14   :  { %1026 = vsyncadd [#allocation10], 4294967200  ;;  %v1037_v0 = vmov 0   ;;  %v101_v1 = vld [vmem:[#allocation3 + $0x40] sm:$0xff]  ;;  %v103_v2 = vld [vmem:[#allocation3 + $0x50] sm:$0xff]  ;;  %vm114_vm0 = vcmask 195584  }
  0x15   :  { %891 = vset.pattern.permute.xlu0 %v1037_v0  ;;  %v104_v3 = vld [vmem:[#allocation3 + $0x58] sm:$0xff]  ;;  %131 = vmatpush.msra.mxu1 %v101_v1  ;;  %v97_v4 = vld [vmem:[#allocation3 + $0x20] sm:$0xff]  ;;  %v99_v5 = vld [vmem:[#allocation3 + $0x30] sm:$0xff]  ;;  %v1038_v15 = vmov 1   ;;  %vm268_vm1 = vcmask 130048   ;;  %vm374_vm12 = vcmask 1042434  }
  0x16   :  { %171 = vmatpush.msra.mxu2 %v103_v2  ;;  %v100_v6 = vld [vmem:[#allocation3 + $0x38] sm:$0xff]  ;;  %191 = vmatpush.msra.mxu3 %v104_v3  ;;  %v93_v7 = vld [vmem:[#allocation3] sm:$0xff]  ;;  %v95_v8 = vld [vmem:[#allocation3 + $0x10] sm:$0xff]  ;;  %vm372_vm14 = vcmask 1040384   ;;  %s1039_s25 = smov [#allocation11]   ;;  %s861_s29 = sshll.u32 %s1226_s7, 4  ;;  %s862_s29 = int_to_ptr.hbm [resolvable:$true] %s861_s29 }
  0x17   :  { %132 = vmatpush.msra.mxu1 %v97_v4  ;;  %v96_v9 = vld [vmem:[#allocation3 + $0x18] sm:$0xff]  ;;  %v92_v10 = vld [vmem:[%s1219_s0] sm:$0xff]  ;;  %v102_v11 = vld [vmem:[#allocation3 + $0x48] sm:$0xff]  ;;  %s859_s26 = sshll.u32 %s1039_s25, 4  ;;  %s860_s26 = int_to_ptr.vmem [resolvable:$true] %s859_s26 }
  0x18   :  { %172 = vmatpush.msra.mxu2 %v99_v5  ;;  %192 = vmatpush.msra.mxu3 %v100_v6  ;;  %v198_v12 = vld [vmem:[%s1220_s1] sm:$0xff]  ;;  %v98_v13 = vld [vmem:[#allocation3 + $0x28] sm:$0xff]  ;;  %v467_v17 = vld [vmem:[#allocation6 + $0x150] sm:$0xff] }
  0x19   :  { %133 = vmatpush.msra.mxu1 %v93_v7  ;;  %203 = vperm.xlu0 %891, %v198_v12   ;;  %v94_v14 = vld [vmem:[#allocation3 + $0x8] sm:$0xff]  ;;  %v464_v18 = vld [vmem:[#allocation6 + $0x138] sm:$0xff]  ;;  %v461_v19 = vld [vmem:[#allocation6 + $0x120] sm:$0xff] }
  0x1a   :  { %173 = vmatpush.msra.mxu2 %v95_v8  ;;  %193 = vmatpush.msra.mxu3 %v96_v9  ;;  %v470_v16 = vld [vmem:[#allocation6 + $0x168] sm:$0xff]  ;;  %v455_v24 = vld [vmem:[#allocation6 + $0xf0] sm:$0xff]  ;;  %v452_v28 = vld [vmem:[#allocation6 + $0xd8] sm:$0xff] }
  0x1b   :  { %873 = vmatmul.msk.f32.vlgmr.msra.gmra.mxu1 %vm114_vm0, %v92_v10  ;;  %875 = vmatmul.msk.f32.vlgmr.msra.gmra.mxu2 %vm114_vm0, %v92_v10  ;;  %v458_v20 = vld [vmem:[#allocation6 + $0x108] sm:$0xff]  ;;  %v515_v25 = vld [vmem:[#allocation6 + $0x2d0] sm:$0xff]  ;;  %v512_v29 = vld [vmem:[#allocation6 + $0x2b8] sm:$0xff] }
  0x1c   :  { %151 = vmatpush.msrb.mxu1 %v102_v11  ;;  %876 = vmatmul.msk.f32.vlgmr.msra.gmra.mxu3 %vm114_vm0, %v92_v10  ;;  %v518_v21 = vld [vmem:[#allocation6 + $0x2e8] sm:$0xff]  ;;  %v449_v31 = vld [vmem:[#allocation6 + $0xc0] sm:$0xff]  ;;  %v443_v40 = vld [vmem:[#allocation6 + $0x90] sm:$0xff] }
  0x1d   :  { %585 = vmatpush.msra.mxu0 %v470_v16  ;;  %v200_v23 = vld [vmem:[#allocation8 + $0x3] ss:$8 sm:$0xf]  ;;  %v1102_v26 = vld [vmem:[#allocation8] ss:$8 sm:$0xf] }
  0x1e   :  { %152 = vmatpush.msrb.mxu1 %v98_v13  ;;  %v224_v27 = vld [vmem:[#allocation8 + $0x4] ss:$8 sm:$0xf]  ;;  %v207_v30 = vperm.slane %v200_v23, 0  ;;  %v106_v33 = vperm.slane %v1102_v26, 0  ;;  %v209_v47 = vperm.slane %v200_v23, 2 }
  0x1f   :  { %586 = vmatpush.msra.mxu0 %v467_v17  ;;  %v509_v32 = vld [vmem:[#allocation6 + $0x2a0] sm:$0xff]  ;;  %v230_v34 = vperm.slane %v224_v27, 0  ;;  %v446_v35 = vld [vmem:[#allocation6 + $0xa8] sm:$0xff]  ;;  %v503_v41 = vld [vmem:[#allocation6 + $0x270] sm:$0xff]  ;;  %v210_v48 = vperm.slane %v200_v23, 3  ;;  %v208_v49 = vperm.slane %v200_v23, 1 }
  0x20   :  { %153 = vmatpush.msrb.mxu1 %v94_v14  ;;  %v506_v36 = vld [vmem:[#allocation6 + $0x288] sm:$0xff]  ;;  %v440_v44 = vld [vmem:[#allocation6 + $0x78] sm:$0xff]  ;;  %v231_v50 = vperm.slane %v224_v27, 1  ;;  %v232_v51 = vperm.slane %v224_v27, 2  ;;  %v233_v52 = vperm.slane %v224_v27, 3  ;;  %v108_v53 = vperm.slane %v1102_v26, 2 }
  0x21   :  { %892 = vset.pattern.permute.xlu0 %v1038_v15  ;;  %587 = vmatpush.msra.mxu0 %v464_v18  ;;  %v500_v45 = vld [vmem:[#allocation6 + $0x258] sm:$0xff]  ;;  %v437_v54 = vld [vmem:[#allocation6 + $0x60] sm:$0xff]  ;;  %v109_v57 = vperm.slane %v1102_v26, 3  ;;  %v107_v58 = vperm.slane %v1102_v26, 1  ;;  %v434_v59 = vld [vmem:[#allocation6 + $0x48] sm:$0xff] }
  0x22   :  { %226 = vperm.xlu0 %892, %v198_v12   ;;  %605 = vmatpush.msra.mxu1 %v518_v21  ;;  %v497_v55 = vld [vmem:[#allocation6 + $0x240] sm:$0xff]  ;;  %v494_v60 = vld [vmem:[#allocation6 + $0x228] sm:$0xff]  ;;  %v431_v8 = vld [vmem:[#allocation6 + $0x30] sm:$0xff] }
  0x23   :  { %874 = vmatmul.msk.f32.vlgmr.msrb.gmra.mxu1 %vm114_vm0, %v92_v10  ;;  %588 = vmatpush.msra.mxu0 %v461_v19  ;;  %v491_v9 = vld [vmem:[#allocation6 + $0x210] sm:$0xff]  ;;  %v428_v15 = vld [vmem:[#allocation6 + $0x18] sm:$0xff]  ;;  %v566_v17 = vld [vmem:[#allocation6 + $0x468] sm:$0xff]  ;;  %vm376_vm0 = vcmask 1041408  }
  0x24   :  { %606 = vmatpush.msra.mxu1 %v515_v25  ;;  %v488_v16 = vld [vmem:[#allocation6 + $0x1f8] sm:$0xff]  ;;  %625 = vmatpush.msrb.mxu2 %v566_v17  ;;  %v485_v25 = vld [vmem:[#allocation6 + $0x1e0] sm:$0xff]  ;;  %v563_v26 = vld [vmem:[#allocation6 + $0x450] sm:$0xff] }
  0x25   :  { %589 = vmatpush.msra.mxu0 %v458_v20 }
  0x26   :  { %607 = vmatpush.msra.mxu1 %v512_v29  ;;  %626 = vmatpush.msrb.mxu2 %v563_v26 }
  0x27   :  { %590 = vmatpush.msra.mxu0 %v455_v24  ;;  %v425_v24 = vld [vmem:[#allocation6] sm:$0xff] }
  0x28   :  { %608 = vmatpush.msra.mxu1 %v509_v32  ;;  %v471_v32 = vld [vmem:[#allocation6 + $0x170] sm:$0xff] }
  0x29   :  { %591 = vmatpush.msra.mxu0 %v452_v28 }
  0x2a   :  { %609 = vmatpush.msra.mxu1 %v506_v36  ;;  %v560_v36 = vld [vmem:[#allocation6 + $0x438] sm:$0xff] }
  0x2b   :  { %592 = vmatpush.msra.mxu0 %v449_v31  ;;  %v569_v31 = vld [vmem:[#allocation6 + $0x480] sm:$0xff]  ;;  %627 = vmatpush.msrb.mxu2 %v560_v36 }
  0x2c   :  { %610 = vmatpush.msra.mxu1 %v503_v41  ;;  %v516_v41 = vld [vmem:[#allocation6 + $0x2d8] sm:$0xff] }
  0x2d   :  { %593 = vmatpush.msra.mxu0 %v446_v35  ;;  %v482_v35 = vld [vmem:[#allocation6 + $0x1c8] sm:$0xff] }
  0x2e   :  { %611 = vmatpush.msra.mxu1 %v500_v45  ;;  %v479_v45 = vld [vmem:[#allocation6 + $0x1b0] sm:$0xff] }
  0x2f   :  { %594 = vmatpush.msra.mxu0 %v443_v40  ;;  %v468_v40 = vld [vmem:[#allocation6 + $0x158] sm:$0xff] }
  0x30   :  { %612 = vmatpush.msra.mxu1 %v497_v55 }
  0x31   :  { %595 = vmatpush.msra.mxu0 %v440_v44 }
  0x32   :  { %613 = vmatpush.msra.mxu1 %v494_v60 }
  0x33   :  { %596 = vmatpush.msra.mxu0 %v437_v54 }
  0x34   :  { %614 = vmatpush.msra.mxu1 %v491_v9 }
  0x35   :  { %597 = vmatpush.msra.mxu0 %v434_v59 }
  0x36   :  { %615 = vmatpush.msra.mxu1 %v488_v16 }
  0x37   :  { %598 = vmatpush.msra.mxu0 %v431_v8  ;;  %v459_v8 = vld [vmem:[#allocation6 + $0x110] sm:$0xff] }
  0x38   :  { %616 = vmatpush.msra.mxu1 %v485_v25  ;;  %v545_v25 = vld [vmem:[#allocation6 + $0x3c0] sm:$0xff] }
  0x39   :  { %599 = vmatpush.msra.mxu0 %v428_v15 }
  0x3a   :  { %617 = vmatpush.msra.mxu1 %v482_v35 }
  0x3b   :  { %600 = vmatpush.msra.mxu0 %v425_v24  ;;  %v564_v24 = vld [vmem:[#allocation6 + $0x458] sm:$0xff] }
  0x3c   :  { %618 = vmatpush.msra.mxu1 %v479_v45 }
  0x8b   :  { %v204_v22 = vpop.permute.xlu0 %203 }
  0x8c   :  { %v215_v37 = vmul.f32 %v207_v30, %v204_v22  ;;  %v217_v63 = vmul.f32 %v209_v47, %v204_v22  ;;  %v218_v0 = vmul.f32 %v210_v48, %v204_v22  ;;  %v216_v1 = vmul.f32 %v208_v49, %v204_v22  ;;  %v572_v22 = vld [vmem:[#allocation6 + $0x498] sm:$0xff] }
  0x8d   :  { %659 = vmatpush.msrb.mxu3 %v572_v22 }
  0x8f   :  { %660 = vmatpush.msrb.mxu3 %v569_v31 }
  0x91   :  { %665 = vmatpush.msra.mxu3 %v471_v32  ;;  %v453_v32 = vld [vmem:[#allocation6 + $0xe0] sm:$0xff] }
  0x93   :  { %666 = vmatpush.msra.mxu3 %v468_v40  ;;  %v542_v40 = vld [vmem:[#allocation6 + $0x3a8] sm:$0xff] }
  0x94   :  { %v227_v39 = vpop.permute.xlu0 %226 }
  0x95   :  { %v238_v43 = vmul.f32 %v230_v34, %v227_v39  ;;  %v239_v2 = vmul.f32 %v231_v50, %v227_v39  ;;  %v240_v3 = vmul.f32 %v232_v51, %v227_v39  ;;  %v241_v4 = vmul.f32 %v233_v52, %v227_v39  ;;  %v465_v51 = vld [vmem:[#allocation6 + $0x140] sm:$0xff] }
  0x96   :  { %v513_v52 = vld [vmem:[#allocation6 + $0x2c0] sm:$0xff]  ;;  %667 = vmatpush.msra.mxu3 %v465_v51  ;;  %v539_v51 = vld [vmem:[#allocation6 + $0x390] sm:$0xff] }
  0x98   :  { %v135_v38 = vpop.f32.mrf.mxu1 }
  0x99   :  { %v136_v42 = vadd.f32 %v135_v38, %v106_v33  ;;  %v519_v33 = vld [vmem:[#allocation6 + $0x2f0] sm:$0xff] }
  0x9a   :  { %685 = vmatpush.msrb.mxu0 %v519_v33  ;;  %v501_v33 = vld [vmem:[#allocation6 + $0x260] sm:$0xff] }
  0x9b   :  { %v219_v46 = vadd.f32 %v215_v37, %v136_v42 }
  0x9c   :  { %686 = vmatpush.msrb.mxu0 %v516_v41 }
  0x9d   :  { %v242_v56 = vadd.f32 %v238_v43, %v219_v46  ;;  %v557_v46 = vld [vmem:[#allocation6 + $0x420] sm:$0xff] }
  0x9e   :  { %v175_v62 = vpop.f32.mrf.mxu2  ;;  %628 = vmatpush.msrb.mxu2 %v557_v46  ;;  %687 = vmatpush.msrb.mxu0 %v513_v52  ;;  %v450_v46 = vld [vmem:[#allocation6 + $0xc8] sm:$0xff] }
  0x9f   :  { %v1108_v61 = vmax.f32 %v242_v56, 0.0  ;;  %v176_v5 = vadd.f32 %v175_v62, %v108_v53  ;;  %v195_v6 = vpop.f32.mrf.mxu3 }
  0xa0   :  { %v155_v7 = vpop.f32.mrf.mxu1  ;;  %v196_v12 = vadd.f32 %v195_v6, %v109_v57  ;;  %v476_v57 = vld [vmem:[#allocation6 + $0x198] sm:$0xff]  ;;  %v473_v6 = vld [vmem:[#allocation6 + $0x180] sm:$0xff] }
  0xa1   :  { %v250_v10 = vrot.slane %v1108_v61, 4  ;;  %v280_v11 = vmul.f32 %v1108_v61, %v1108_v61  ;;  %v156_v13 = vadd.f32 %v155_v7, %v107_v58  ;;  %v221_v14 = vadd.f32 %v217_v63, %v176_v5  ;;  %v554_v58 = vld [vmem:[#allocation6 + $0x408] sm:$0xff]  ;;  %619 = vmatpush.msra.mxu1 %v476_v57  ;;  %v551_v7 = vld [vmem:[#allocation6 + $0x3f0] sm:$0xff] }
  0xa2   :  { %v222_v20 = vadd.f32 %v218_v0, %v196_v12  ;;  %v462_v63 = vld [vmem:[#allocation6 + $0x128] sm:$0xff]  ;;  %629 = vmatpush.msrb.mxu2 %v554_v58  ;;  %v567_v12 = vld [vmem:[#allocation6 + $0x470] sm:$0xff] }
  0xa3   :  { %v251_v18 = vadd.f32 %v250_v10, %v1108_v61  ;;  %v284_v19 = vrot.slane %v280_v11, 4  ;;  %v220_v21 = vadd.f32 %v216_v1, %v156_v13  ;;  %v244_v23 = vadd.f32 %v240_v3, %v221_v14  ;;  %v510_v0 = vld [vmem:[#allocation6 + $0x2a8] sm:$0xff]  ;;  %668 = vmatpush.msra.mxu3 %v462_v63  ;;  %v548_v13 = vld [vmem:[#allocation6 + $0x3d8] sm:$0xff]  ;;  %620 = vmatpush.msra.mxu1 %v473_v6  ;;  %v447_v57 = vld [vmem:[#allocation6 + $0xb0] sm:$0xff] }
  0xa4   :  { %v245_v29 = vadd.f32 %v241_v4, %v222_v20  ;;  %688 = vmatpush.msrb.mxu0 %v510_v0  ;;  %630 = vmatpush.msrb.mxu2 %v551_v7  ;;  %v456_v20 = vld [vmem:[#allocation6 + $0xf8] sm:$0xff]  ;;  %v495_v58 = vld [vmem:[#allocation6 + $0x230] sm:$0xff] }
  0xa5   :  { %v252_v27 = vrot.slane %v251_v18, 2  ;;  %v285_v28 = vadd.f32 %v284_v19, %v280_v11  ;;  %v243_v30 = vadd.f32 %v239_v2, %v220_v21  ;;  %v1114_v34 = vmax.f32 %v244_v23, 0.0  ;;  %v507_v11 = vld [vmem:[#allocation6 + $0x290] sm:$0xff]  ;;  %v504_v21 = vld [vmem:[#allocation6 + $0x278] sm:$0xff]  ;;  %669 = vmatpush.msra.mxu3 %v459_v8  ;;  %705 = vmatpush.msrb.mxu1 %v567_v12 }
  0xa6   :  { %v1116_v38 = vmax.f32 %v245_v29, 0.0  ;;  %689 = vmatpush.msrb.mxu0 %v507_v11  ;;  %631 = vmatpush.msrb.mxu2 %v548_v13  ;;  %v536_v63 = vld [vmem:[#allocation6 + $0x378] sm:$0xff] }
  0xa7   :  { %v286_v37 = vrot.slane %v285_v28, 2  ;;  %v1118_v39 = vmax.f32 %v243_v30, 0.0  ;;  %v253_v42 = vadd.f32 %v252_v27, %v251_v18  ;;  %v262_v43 = vrot.slane %v1114_v34, 4  ;;  %670 = vmatpush.msra.mxu3 %v456_v20  ;;  %706 = vmatpush.msrb.mxu1 %v564_v24  ;;  %v552_v8 = vld [vmem:[#allocation6 + $0x3f8] sm:$0xff]  ;;  %v546_v24 = vld [vmem:[#allocation6 + $0x3c8] sm:$0xff] }
  0xa8   :  { %v282_v44 = vmul.f32 %v1114_v34, %v1114_v34  ;;  %v269_v48 = vsel %vm268_vm1, %v1116_v38, 0.0  ;;  %v283_v49 = vmul.f32 %v1116_v38, %v1116_v38  ;;  %690 = vmatpush.msrb.mxu0 %v504_v21  ;;  %632 = vmatpush.msrb.mxu2 %v545_v25  ;;  %v438_v21 = vld [vmem:[#allocation6 + $0x68] sm:$0xff]  ;;  %v527_v25 = vld [vmem:[#allocation6 + $0x330] sm:$0xff] }
  0xa9   :  { %v287_v47 = vadd.f32 %v286_v37, %v285_v28  ;;  %v256_v50 = vrot.slane %v1118_v39, 4  ;;  %v263_v53 = vadd.f32 %v262_v43, %v1114_v34  ;;  %v270_v55 = vrot.slane %v269_v48, 4  ;;  %v561_v37 = vld [vmem:[#allocation6 + $0x440] sm:$0xff]  ;;  %671 = vmatpush.msra.mxu3 %v453_v32  ;;  %v524_v32 = vld [vmem:[#allocation6 + $0x318] sm:$0xff] }
  0xaa   :  { %v296_v54 = vrot.slane %v282_v44, 4  ;;  %v281_v56 = vmul.f32 %v1118_v39, %v1118_v39  ;;  %v302_v60 = vsel %vm268_vm1, %v283_v49, 0.0  ;;  %v254_v1 = vrot.slane %v253_v42, 1  ;;  %691 = vmatpush.msrb.mxu0 %v501_v33  ;;  %707 = vmatpush.msrb.mxu1 %v561_v37  ;;  %v432_v33 = vld [vmem:[#allocation6 + $0x38] sm:$0xff] }
  0xab   :  { %v288_v59 = vrot.slane %v287_v47, 1  ;;  %v257_v62 = vadd.f32 %v256_v50, %v1118_v39  ;;  %v264_v2 = vrot.slane %v263_v53, 2  ;;  %v271_v4 = vadd.f32 %v270_v55, %v269_v48  ;;  %v558_v50 = vld [vmem:[#allocation6 + $0x428] sm:$0xff]  ;;  %633 = vmatpush.msrb.mxu2 %v542_v40  ;;  %672 = vmatpush.msra.mxu3 %v450_v46  ;;  %v540_v37 = vld [vmem:[#allocation6 + $0x398] sm:$0xff]  ;;  %v521_v40 = vld [vmem:[#allocation6 + $0x300] sm:$0xff] }
  0xac   :  { %v297_v3 = vadd.f32 %v296_v54, %v282_v44  ;;  %v303_v5 = vrot.slane %v302_v60, 4  ;;  %v290_v10 = vrot.slane %v281_v56, 4  ;;  %v255_v14 = vadd.f32 %v254_v1, %v253_v42  ;;  %708 = vmatpush.msrb.mxu1 %v558_v50 }
  0xad   :  { %v258_v9 = vrot.slane %v257_v62, 2  ;;  %v289_v15 = vadd.f32 %v288_v59, %v287_v47  ;;  %v265_v16 = vadd.f32 %v264_v2, %v263_v53  ;;  %v272_v18 = vrot.slane %v271_v4, 2  ;;  %v498_v47 = vld [vmem:[#allocation6 + $0x248] sm:$0xff]  ;;  %634 = vmatpush.msrb.mxu2 %v539_v51  ;;  %673 = vmatpush.msra.mxu3 %v447_v57 }
  0xae   :  { %v298_v17 = vrot.slane %v297_v3, 2  ;;  %v304_v19 = vadd.f32 %v303_v5, %v302_v60  ;;  %v291_v23 = vadd.f32 %v290_v10, %v281_v56  ;;  %v1133_v26 = vmul.f32 0.125, %v255_v14  ;;  %692 = vmatpush.msrb.mxu0 %v498_v47  ;;  %v492_v5 = vld [vmem:[#allocation6 + $0x218] sm:$0xff]  ;;  %v441_v14 = vld [vmem:[#allocation6 + $0x80] sm:$0xff]  ;;  %v426_v47 = vld [vmem:[#allocation6 + $0x8] sm:$0xff] }
  0xaf   :  { %v259_v22 = vadd.f32 %v258_v9, %v257_v62  ;;  %v309_v27 = vmul.f32 0.125, %v289_v15  ;;  %v266_v28 = vrot.slane %v265_v16, 1  ;;  %v273_v30 = vadd.f32 %v272_v18, %v271_v4  ;;  %v555_v62 = vld [vmem:[#allocation6 + $0x410] sm:$0xff]  ;;  %v444_v4 = vld [vmem:[#allocation6 + $0x98] sm:$0xff]  ;;  %v533_v9 = vld [vmem:[#allocation6 + $0x360] sm:$0xff]  ;;  %635 = vmatpush.msrb.mxu2 %v536_v63 }
  0xb0   :  { %v299_v29 = vadd.f32 %v298_v17, %v297_v3  ;;  %v305_v31 = vrot.slane %v304_v19, 2  ;;  %v292_v36 = vrot.slane %v291_v23, 2  ;;  %v313_v41 = vmul.f32 %v1133_v26, %v1133_v26  ;;  %693 = vmatpush.msrb.mxu0 %v495_v58  ;;  %709 = vmatpush.msrb.mxu1 %v555_v62  ;;  %v489_v15 = vld [vmem:[#allocation6 + $0x200] sm:$0xff]  ;;  %v530_v18 = vld [vmem:[#allocation6 + $0x348] sm:$0xff] }
  0xb1   :  { %v260_v35 = vrot.slane %v259_v22, 1  ;;  %v267_v42 = vadd.f32 %v266_v28, %v265_v16  ;;  %v274_v44 = vrot.slane %v273_v30, 1  ;;  %674 = vmatpush.msra.mxu3 %v444_v4  ;;  %v549_v17 = vld [vmem:[#allocation6 + $0x3e0] sm:$0xff]  ;;  %636 = vmatpush.msrb.mxu2 %v533_v9  ;;  %v435_v28 = vld [vmem:[#allocation6 + $0x50] sm:$0xff]  ;;  %v534_v51 = vld [vmem:[#allocation6 + $0x368] sm:$0xff] }
  0xb2   :  { %v300_v43 = vrot.slane %v299_v29, 1  ;;  %v306_v45 = vadd.f32 %v305_v31, %v304_v19  ;;  %v293_v49 = vadd.f32 %v292_v36, %v291_v23  ;;  %v317_v52 = vsub.f32 %v309_v27, %v313_v41  ;;  %694 = vmatpush.msrb.mxu0 %v492_v5  ;;  %710 = vmatpush.msrb.mxu1 %v552_v8  ;;  %v543_v31 = vld [vmem:[#allocation6 + $0x3b0] sm:$0xff]  ;;  %v429_v41 = vld [vmem:[#allocation6 + $0x20] sm:$0xff] }
  0xb3   :  { %v261_v48 = vadd.f32 %v260_v35, %v259_v22  ;;  %v1137_v53 = vmul.f32 0.125, %v267_v42  ;;  %v275_v55 = vadd.f32 %v274_v44, %v273_v30  ;;  %v486_v22 = vld [vmem:[#allocation6 + $0x1e8] sm:$0xff]  ;;  %675 = vmatpush.msra.mxu3 %v441_v14  ;;  %637 = vmatpush.msrb.mxu2 %v530_v18  ;;  %v480_v35 = vld [vmem:[#allocation6 + $0x1b8] sm:$0xff]  ;;  %v477_v42 = vld [vmem:[#allocation6 + $0x1a0] sm:$0xff] }
  0xb4   :  { %v301_v54 = vadd.f32 %v300_v43, %v299_v29  ;;  %v307_v56 = vrot.slane %v306_v45, 1  ;;  %v294_v60 = vrot.slane %v293_v49, 1  ;;  %v1147_v10 = vadd.f32 1e-05, %v317_v52  ;;  %695 = vmatpush.msrb.mxu0 %v489_v15  ;;  %711 = vmatpush.msrb.mxu1 %v549_v17  ;;  %v483_v29 = vld [vmem:[#allocation6 + $0x1d0] sm:$0xff]  ;;  %v537_v44 = vld [vmem:[#allocation6 + $0x380] sm:$0xff] }
  0xb5   :  { %v1139_v59 = vmul.f32 0.125, %v261_v48  ;;  %v315_v1 = vmul.f32 %v1137_v53, %v1137_v53  ;;  %v1143_v2 = vmul.f32 0.125, %v275_v55  ;;  %676 = vmatpush.msra.mxu3 %v438_v21  ;;  %638 = vmatpush.msrb.mxu2 %v527_v25  ;;  %v474_v48 = vld [vmem:[#allocation6 + $0x188] sm:$0xff] }
  0xb6   :  { %v311_v0 = vmul.f32 0.125, %v301_v54  ;;  %v308_v3 = vadd.f32 %v307_v56, %v306_v45  ;;  %v295_v6 = vadd.f32 %v294_v60, %v293_v49  ;;  %893 = vrsqrt.f32 %v1147_v10  ;;  %696 = vmatpush.msrb.mxu0 %v486_v22  ;;  %712 = vmatpush.msrb.mxu1 %v546_v24  ;;  %v573_v45 = vld [vmem:[#allocation6 + $0x4a0] sm:$0xff]  ;;  %v570_v52 = vld [vmem:[#allocation6 + $0x488] sm:$0xff] }
  0xb7   :  { %v314_v7 = vmul.f32 %v1139_v59, %v1139_v59  ;;  %v316_v13 = vmul.f32 %v1143_v2, %v1143_v2  ;;  %677 = vmatpush.msra.mxu3 %v435_v28  ;;  %639 = vmatpush.msrb.mxu2 %v524_v32  ;;  %v522_v18 = vld [vmem:[#allocation6 + $0x308] sm:$0xff]  ;;  %vm331_vm13 = vweird.f32 %v1147_v10 }
  0xb8   :  { %v319_v11 = vsub.f32 %v311_v0, %v315_v1  ;;  %v312_v12 = vmul.f32 0.125, %v308_v3  ;;  %v310_v16 = vmul.f32 0.125, %v295_v6  ;;  %697 = vmatpush.msrb.mxu0 %v483_v29  ;;  %713 = vmatpush.msrb.mxu1 %v543_v31  ;;  %v531_v1 = vld [vmem:[#allocation6 + $0x350] sm:$0xff] }
  0xb9   :  { %678 = vmatpush.msra.mxu3 %v432_v33  ;;  %640 = vmatpush.msrb.mxu2 %v521_v40 }
  0xba   :  { %v1152_v19 = vadd.f32 1e-05, %v319_v11  ;;  %v320_v20 = vsub.f32 %v312_v12, %v316_v13  ;;  %v318_v23 = vsub.f32 %v310_v16, %v314_v7  ;;  %698 = vmatpush.msrb.mxu0 %v480_v35  ;;  %714 = vmatpush.msrb.mxu1 %v540_v37  ;;  %v528_v7 = vld [vmem:[#allocation6 + $0x338] sm:$0xff]  ;;  %v525_v12 = vld [vmem:[#allocation6 + $0x320] sm:$0xff] }
  0xbb   :  { %679 = vmatpush.msra.mxu3 %v429_v41  ;;  %739 = vmatpush.msra.mxu2 %v573_v45 }
  0xbc   :  { %895 = vrsqrt.f32 %v1152_v19  ;;  %v1155_v27 = vadd.f32 1e-05, %v320_v20  ;;  %v1157_v30 = vadd.f32 1e-05, %v318_v23  ;;  %v1160_v36 = vpop.eup %893  ;;  %699 = vmatpush.msrb.mxu0 %v477_v42  ;;  %715 = vmatpush.msrb.mxu1 %v537_v44  ;;  %vm351_vm3 = vweird.f32 %v1152_v19 }
  0xbd   :  { %v326_v43 = vmul.f32 %v1160_v36, %v1147_v10  ;;  %680 = vmatpush.msra.mxu3 %v426_v47  ;;  %740 = vmatpush.msra.mxu2 %v570_v52  ;;  %vm332_vm10 = vweird.f32 %v1160_v36  ;;  %v89_v23 = vld [vmem:[#allocation8 + $0x1] ss:$8 sm:$0xf] }
  0xbe   :  { %897 = vrsqrt.f32 %v1155_v27  ;;  %700 = vmatpush.msrb.mxu0 %v474_v48  ;;  %716 = vmatpush.msrb.mxu1 %v534_v51  ;;  %vm361_vm7 = vweird.f32 %v1155_v27  ;;  %vm341_vm8 = vweird.f32 %v1157_v30  ;;  %vm333_vm15 = vmor %vm331_vm13, %vm332_vm10 }
  0xbf   :  { %899 = vrsqrt.f32 %v1157_v30  ;;  %v327_v49 = vmul.f32 %v1160_v36, %v326_v43  ;;  %v91_v43 = vld [vmem:[#allocation8 + $0x2] ss:$8 sm:$0xf] }
  0xc0   :  { %717 = vmatpush.msrb.mxu1 %v531_v1  ;;  %v562_v1 = vld [vmem:[#allocation6 + $0x448] sm:$0xff] }
  0xc1   :  { %v328_v60 = vmul.f32 0.5, %v327_v49 }
  0xc2   :  { %v896_v46 = vpop.eup %895  ;;  %718 = vmatpush.msrb.mxu1 %v528_v7  ;;  %v460_v7 = vld [vmem:[#allocation6 + $0x118] sm:$0xff] }
  0xc3   :  { %v346_v50 = vmul.f32 %v896_v46, %v1152_v19  ;;  %vm352_vm2 = vweird.f32 %v896_v46  ;;  %v329_v6 = vsub.f32 1.5, %v328_v60  ;;  %v565_v60 = vld [vmem:[#allocation6 + $0x460] sm:$0xff] }
  0xc4   :  { %v898_v54 = vpop.eup %897  ;;  %vm353_vm6 = vmor %vm351_vm3, %vm352_vm2  ;;  %719 = vmatpush.msrb.mxu1 %v525_v12  ;;  %v553_v12 = vld [vmem:[#allocation6 + $0x400] sm:$0xff]  ;;  %vm852_vm2 = vcmask 57344  }
  0xc5   :  { %v900_v55 = vpop.eup %899  ;;  %v347_v56 = vmul.f32 %v896_v46, %v346_v50  ;;  %v356_v57 = vmul.f32 %v898_v54, %v1155_v27  ;;  %vm362_vm4 = vweird.f32 %v898_v54  ;;  %v330_v15 = vmul.f32 %v1160_v36, %v329_v6  ;;  %v508_v6 = vld [vmem:[#allocation6 + $0x298] sm:$0xff] }
  0xc6   :  { %v336_v58 = vmul.f32 %v900_v55, %v1157_v30  ;;  %vm342_vm5 = vweird.f32 %v900_v55  ;;  %vm363_vm9 = vmor %vm361_vm7, %vm362_vm4  ;;  %720 = vmatpush.msrb.mxu1 %v522_v18  ;;  %v547_v18 = vld [vmem:[#allocation6 + $0x3d0] sm:$0xff] }
  0xc7   :  { %v348_v62 = vmul.f32 0.5, %v347_v56  ;;  %v357_v63 = vmul.f32 %v898_v54, %v356_v57  ;;  %vm343_vm11 = vmor %vm341_vm8, %vm342_vm5  ;;  %v334_v24 = vsel %vm333_vm15, %v1160_v36, %v330_v15  ;;  %v472_v57 = vld [vmem:[#allocation6 + $0x178] sm:$0xff]  ;;  %v550_v15 = vld [vmem:[#allocation6 + $0x3e8] sm:$0xff] }
  0xc8   :  { %v337_v0 = vmul.f32 %v900_v55, %v336_v58  ;;  %v517_v58 = vld [vmem:[#allocation6 + $0x2e0] sm:$0xff] }
  0xc9   :  { %v349_v3 = vsub.f32 1.5, %v348_v62  ;;  %v358_v4 = vmul.f32 0.5, %v357_v63  ;;  %v571_v62 = vld [vmem:[#allocation6 + $0x490] sm:$0xff]  ;;  %v466_v63 = vld [vmem:[#allocation6 + $0x148] sm:$0xff] }
  0xca   :  { %v338_v5 = vmul.f32 0.5, %v337_v0  ;;  %v514_v0 = vld [vmem:[#allocation6 + $0x2c8] sm:$0xff] }
  0xcb   :  { %v359_v8 = vsub.f32 1.5, %v358_v4  ;;  %v350_v9 = vmul.f32 %v896_v46, %v349_v3  ;;  %v463_v3 = vld [vmem:[#allocation6 + $0x130] sm:$0xff] }
  0xcc   :  { %v339_v11 = vsub.f32 1.5, %v338_v5  ;;  %v511_v4 = vld [vmem:[#allocation6 + $0x2b0] sm:$0xff] }
  0xcd   :  { %v354_v13 = vsel %vm353_vm6, %v896_v46, %v350_v9  ;;  %v360_v14 = vmul.f32 %v898_v54, %v359_v8  ;;  %v559_v5 = vld [vmem:[#allocation6 + $0x430] sm:$0xff]  ;;  %v556_v8 = vld [vmem:[#allocation6 + $0x418] sm:$0xff]  ;;  %v505_v9 = vld [vmem:[#allocation6 + $0x280] sm:$0xff] }
  0xce   :  { %v340_v16 = vmul.f32 %v900_v55, %v339_v11  ;;  %v370_v17 = vrot.slane %v354_v13, 6  ;;  %v457_v11 = vld [vmem:[#allocation6 + $0x100] sm:$0xff]  ;;  %v502_v13 = vld [vmem:[#allocation6 + $0x268] sm:$0xff] }
  0xcf   :  { %v364_v19 = vsel %vm363_vm9, %v898_v54, %v360_v14  ;;  %v454_v14 = vld [vmem:[#allocation6 + $0xe8] sm:$0xff] }
  0xd0   :  { %v344_v20 = vsel %vm343_vm11, %v900_v55, %v340_v16  ;;  %v371_v21 = vrot.slane %v364_v19, 5  ;;  %v499_v16 = vld [vmem:[#allocation6 + $0x250] sm:$0xff]  ;;  %v496_v19 = vld [vmem:[#allocation6 + $0x238] sm:$0xff] }
  0xd1   :  { %v369_v22 = vrot.slane %v344_v20, 7  ;;  %v448_v20 = vld [vmem:[#allocation6 + $0xb8] sm:$0xff] }
  0xd2   :  { %v375_v25 = vsel %vm374_vm12, %v370_v17, %v371_v21  ;;  %v451_v17 = vld [vmem:[#allocation6 + $0xd0] sm:$0xff]  ;;  %v544_v21 = vld [vmem:[#allocation6 + $0x3b8] sm:$0xff] }
  0xd3   :  { %v373_v27 = vsel %vm372_vm14, %v334_v24, %v369_v22  ;;  %v493_v22 = vld [vmem:[#allocation6 + $0x220] sm:$0xff] }
  0xd4   :  { %v377_v28 = vsel %vm376_vm0, %v373_v27, %v375_v25  ;;  %v541_v24 = vld [vmem:[#allocation6 + $0x3a0] sm:$0xff]  ;;  %v490_v25 = vld [vmem:[#allocation6 + $0x208] sm:$0xff] }
  0xd5   :  { %v379_v29 = vmul.f32 %v377_v28, %v89_v23  ;;  %v445_v23 = vld [vmem:[#allocation6 + $0xa0] sm:$0xff]  ;;  %v442_v27 = vld [vmem:[#allocation6 + $0x88] sm:$0xff] }
  0xd6   :  { %v538_v28 = vld [vmem:[#allocation6 + $0x388] sm:$0xff] }
  0xd7   :  { %v381_v30 = vperm.slane %v379_v29, 0  ;;  %v382_v31 = vperm.slane %v379_v29, 1  ;;  %v383_v32 = vperm.slane %v379_v29, 2  ;;  %v384_v10 = vperm.slane %v379_v29, 3  ;;  %v487_v29 = vld [vmem:[#allocation6 + $0x1f0] sm:$0xff] }
  0xd9   :  { %v390_v33 = vmul.f32 %v382_v31, %v1139_v59  ;;  %v391_v35 = vmul.f32 %v383_v32, %v1137_v53  ;;  %v392_v37 = vmul.f32 %v384_v10, %v1143_v2  ;;  %v389_v40 = vmul.f32 %v381_v30, %v1133_v26 }
  0xda   :  { %v405_v48 = vmul.f32 %v381_v30, %v1108_v61  ;;  %v406_v59 = vmul.f32 %v382_v31, %v1118_v39  ;;  %v407_v53 = vmul.f32 %v383_v32, %v1114_v34  ;;  %v408_v2 = vmul.f32 %v384_v10, %v1116_v38  ;;  %v520_v61 = vld [vmem:[#allocation6 + $0x2f8] sm:$0xff]  ;;  %v574_v38 = vld [vmem:[#allocation6 + $0x4a8] sm:$0xff]  ;;  %v469_v39 = vld [vmem:[#allocation6 + $0x160] sm:$0xff] }
  0xdb   :  { %v397_v36 = vrot.slane %v390_v33, 7  ;;  %v398_v41 = vrot.slane %v391_v35, 6  ;;  %v399_v42 = vrot.slane %v392_v37, 5  ;;  %v568_v34 = vld [vmem:[#allocation6 + $0x478] sm:$0xff]  ;;  %v439_v30 = vld [vmem:[#allocation6 + $0x70] sm:$0xff]  ;;  %v481_v35 = vld [vmem:[#allocation6 + $0x1c0] sm:$0xff] }
  0xdc   :  { %v535_v31 = vld [vmem:[#allocation6 + $0x370] sm:$0xff]  ;;  %v484_v32 = vld [vmem:[#allocation6 + $0x1d8] sm:$0xff]  ;;  %v433_v37 = vld [vmem:[#allocation6 + $0x40] sm:$0xff] }
  0xdd   :  { %v400_v44 = vsel %vm372_vm14, %v389_v40, %v397_v36  ;;  %v401_v45 = vsel %vm374_vm12, %v398_v41, %v399_v42  ;;  %v436_v10 = vld [vmem:[#allocation6 + $0x58] sm:$0xff]  ;;  %v529_v40 = vld [vmem:[#allocation6 + $0x340] sm:$0xff]  ;;  %v478_v36 = vld [vmem:[#allocation6 + $0x1a8] sm:$0xff] }
  0xde   :  { %v402_v46 = vsel %vm376_vm0, %v400_v44, %v401_v45  ;;  %v532_v33 = vld [vmem:[#allocation6 + $0x358] sm:$0xff]  ;;  %v430_v41 = vld [vmem:[#allocation6 + $0x28] sm:$0xff]  ;;  %v427_v44 = vld [vmem:[#allocation6 + $0x10] sm:$0xff] }
  0xdf   :  { %v404_v47 = vsub.f32 %v91_v43, %v402_v46  ;;  %v526_v42 = vld [vmem:[#allocation6 + $0x328] sm:$0xff]  ;;  %v475_v43 = vld [vmem:[#allocation6 + $0x190] sm:$0xff] }
  0xe0   :  { %v523_v45 = vld [vmem:[#allocation6 + $0x310] sm:$0xff] }
  0xe1   :  { %v410_v26 = vperm.slane %v404_v47, 0  ;;  %v411_v49 = vperm.slane %v404_v47, 1  ;;  %v412_v50 = vperm.slane %v404_v47, 2  ;;  %v413_v51 = vperm.slane %v404_v47, 3 }
  0xe3   :  { %v1190_v52 = vadd.f32 %v410_v26, %v405_v48  ;;  %v1192_v54 = vadd.f32 %v411_v49, %v406_v59  ;;  %v1194_v55 = vadd.f32 %v412_v50, %v407_v53  ;;  %v1196_v56 = vadd.f32 %v413_v51, %v408_v2  ;;  %v422_v59 = vld [vmem:[#allocation9] ss:$2 sm:$0x7] }
  0xe4   :  { %v577_v53 = vperm.slane %v422_v59, 1  ;;  %v576_v49 = vperm.slane %v422_v59, 0 }
  0xe5   :  { %601 = vmatmul.f32.vlgmr.msra.gmra.mxu0 %v1190_v52  ;;  %621 = vmatmul.f32.vlgmr.msra.gmra.mxu1 %v1192_v54 }
  0xe6   :  { %641 = vmatmul.f32.vlgmr.msrb.gmra.mxu2 %v1194_v55  ;;  %877 = vmatmul.msk.f32.vlgmr.msrb.gmra.mxu3 %vm268_vm1, %v1196_v56 }
  0xe7   :  { %745 = vmatpush.msrb.mxu2 %v472_v57  ;;  %765 = vmatpush.msrb.mxu3 %v520_v61 }
  0xe8   :  { %785 = vmatpush.msra.mxu0 %v568_v34  ;;  %819 = vmatpush.msra.mxu1 %v574_v38 }
  0xe9   :  { %746 = vmatpush.msrb.mxu2 %v469_v39  ;;  %766 = vmatpush.msrb.mxu3 %v517_v58  ;;  %v578_v39 = vperm.slane %v422_v59, 2 }
  0xea   :  { %786 = vmatpush.msra.mxu0 %v565_v60  ;;  %820 = vmatpush.msra.mxu1 %v571_v62 }
  0xeb   :  { %747 = vmatpush.msrb.mxu2 %v466_v63  ;;  %767 = vmatpush.msrb.mxu3 %v514_v0  ;;  %v424_v0 = vld [vmem:[#allocation9 + $0x1] ss:$2 sm:$0x7] }
  0xec   :  { %787 = vmatpush.msra.mxu0 %v562_v1 }
  0xed   :  { %748 = vmatpush.msrb.mxu2 %v463_v3  ;;  %768 = vmatpush.msrb.mxu3 %v511_v4  ;;  %v830_v4 = vperm.slane %v424_v0, 1 }
  0xee   :  { %788 = vmatpush.msra.mxu0 %v559_v5  ;;  %681 = vmatmul.f32.vlgmr.msra.gmra.mxu3 %v1190_v52 }
  0xef   :  { %701 = vmatmul.f32.vlgmr.msrb.gmra.mxu0 %v1192_v54  ;;  %721 = vmatmul.f32.vlgmr.msrb.gmra.mxu1 %v1194_v55 }
  0xf0   :  { %878 = vmatmul.msk.f32.vlgmr.msra.gmra.mxu2 %vm268_vm1, %v1196_v56  ;;  %769 = vmatpush.msrb.mxu3 %v508_v6 }
  0xf1   :  { %749 = vmatpush.msrb.mxu2 %v460_v7  ;;  %789 = vmatpush.msra.mxu0 %v556_v8  ;;  %v829_v8 = vperm.slane %v424_v0, 0 }
  0xf2   :  { %770 = vmatpush.msrb.mxu3 %v505_v9 }
  0xf3   :  { %750 = vmatpush.msrb.mxu2 %v457_v11  ;;  %790 = vmatpush.msra.mxu0 %v553_v12  ;;  %v831_v12 = vperm.slane %v424_v0, 2 }
  0xf4   :  { %771 = vmatpush.msrb.mxu3 %v502_v13 }
  0xf5   :  { %751 = vmatpush.msrb.mxu2 %v454_v14  ;;  %791 = vmatpush.msra.mxu0 %v550_v15 }
  0xf6   :  { %772 = vmatpush.msrb.mxu3 %v499_v16 }
  0xf7   :  { %752 = vmatpush.msrb.mxu2 %v451_v17  ;;  %792 = vmatpush.msra.mxu0 %v547_v18 }
  0xf8   :  { %773 = vmatpush.msrb.mxu3 %v496_v19  ;;  %879 = vmatmul.msk.f32.vlgmr.msra.gmra.mxu1 %vm268_vm1, %v1196_v56  ;;  %vm839_vm1 = vcmask 359424  }
  0xf9   :  { %753 = vmatpush.msrb.mxu2 %v448_v20  ;;  %793 = vmatpush.msra.mxu0 %v544_v21  ;;  %v848_v20 = vlaneseq  ;;  %v845_v21 = vstv %s1225_s6 }
  0xfa   :  { %774 = vmatpush.msrb.mxu3 %v493_v22 }
  0xfb   :  { %754 = vmatpush.msrb.mxu2 %v445_v23  ;;  %794 = vmatpush.msra.mxu0 %v541_v24  ;;  %v849_v22 = vand.u32 127, %v848_v20 }
  0xfc   :  { %775 = vmatpush.msrb.mxu3 %v490_v25 }
  0xfd   :  { %755 = vmatpush.msrb.mxu2 %v442_v27  ;;  %795 = vmatpush.msra.mxu0 %v538_v28 }
  0xfe   :  { %776 = vmatpush.msrb.mxu3 %v487_v29 }
  0xff   :  { %756 = vmatpush.msrb.mxu2 %v439_v30  ;;  %796 = vmatpush.msra.mxu0 %v535_v31 }
 0x100   :  { %777 = vmatpush.msrb.mxu3 %v484_v32 }
 0x101   :  { %757 = vmatpush.msrb.mxu2 %v436_v10  ;;  %797 = vmatpush.msra.mxu0 %v532_v33 }
 0x102   :  { %778 = vmatpush.msrb.mxu3 %v481_v35 }
 0x103   :  { %758 = vmatpush.msrb.mxu2 %v433_v37  ;;  %798 = vmatpush.msra.mxu0 %v529_v40 }
 0x104   :  { %779 = vmatpush.msrb.mxu3 %v478_v36 }
 0x105   :  { %759 = vmatpush.msrb.mxu2 %v430_v41  ;;  %799 = vmatpush.msra.mxu0 %v526_v42 }
 0x106   :  { %780 = vmatpush.msrb.mxu3 %v475_v43 }
 0x107   :  { %760 = vmatpush.msrb.mxu2 %v427_v44  ;;  %800 = vmatpush.msra.mxu0 %v523_v45 }
 0x108   :  { %761 = vmatmul.f32.vlgmr.msrb.gmra.mxu2 %v1190_v52  ;;  %781 = vmatmul.f32.vlgmr.msrb.gmra.mxu3 %v1192_v54 }
 0x109   :  { %801 = vmatmul.f32.vlgmr.msra.gmra.mxu0 %v1194_v55 }
 0x162   :  { %v602_v47 = vpop.f32.mrf.mxu0  ;;  %v622_v2 = vpop.f32.mrf.mxu1 }
 0x163   :  { %v603_v56 = vadd.f32 %v602_v47, %v576_v49 }
 0x165   :  { %v623_v38 = vadd.f32 %v622_v2, %v603_v56 }
 0x169   :  { %v662_v46 = vpop.f32.mrf.mxu3  ;;  %v642_v48 = vpop.f32.mrf.mxu2 }
 0x16a   :  { %v643_v54 = vadd.f32 %v642_v48, %v623_v38 }
 0x16c   :  { %v702_v51 = vpop.f32.mrf.mxu0  ;;  %v722_v34 = vpop.f32.mrf.mxu1  ;;  %v663_v62 = vadd.f32 %v662_v46, %v643_v54 }
 0x16e   :  { %v825_v7 = vmax.f32 %v663_v62, 0.0 }
 0x170   :  { %v835_v15 = vmul.f32 %v829_v8, %v825_v7 }
 0x171   :  { %v682_v26 = vpop.f32.mrf.mxu3 }
 0x172   :  { %v683_v50 = vadd.f32 %v682_v26, %v577_v53 }
 0x173   :  { %v742_v61 = vpop.f32.mrf.mxu2 }
 0x174   :  { %v703_v57 = vadd.f32 %v702_v51, %v683_v50 }
 0x175   :  { %v822_v9 = vpop.f32.mrf.mxu1 }
 0x176   :  { %v723_v52 = vadd.f32 %v722_v34, %v703_v57 }
 0x178   :  { %v743_v58 = vadd.f32 %v742_v61, %v723_v52 }
 0x17a   :  { %v826_v3 = vmax.f32 %v743_v58, 0.0 }
 0x17c   :  { %v836_v13 = vmul.f32 %v830_v4, %v826_v3 }
 0x17e   :  { %v838_v17 = vadd.f32 %v836_v13, %v835_v15 }
 0x186   :  { %v802_v5 = vpop.f32.mrf.mxu0 }
 0x18b   :  { %v762_v55 = vpop.f32.mrf.mxu2  ;;  %v782_v63 = vpop.f32.mrf.mxu3 }
 0x18c   :  { %v763_v60 = vadd.f32 %v762_v55, %v578_v39 }
 0x18e   :  { %v783_v1 = vadd.f32 %v782_v63, %v763_v60 }
 0x190   :  { %v803_v6 = vadd.f32 %v802_v5, %v783_v1 }
 0x192   :  { %v823_v11 = vadd.f32 %v822_v9, %v803_v6 }
 0x194   :  { %v827_v14 = vmax.f32 %v823_v11, 0.0 }
 0x196   :  { %v837_v16 = vmul.f32 %v831_v12, %v827_v14 }
 0x198   :  { %v840_v18 = vsel %vm839_vm1, %v837_v16, 0.0 }
 0x199   :  { %v841_v19 = vadd.f32 %v840_v18, %v838_v17 }
 0x19b   :  { %842 = vadd.xlane.f32.xlu1 %v841_v19 }
 0x20e   :  { %v843_v23 = vpop.xlane.xlu1 %842 }
 0x20f   :  { %v846_v24 = vadd.f32 %v845_v21, %v843_v23 }
 0x211   :  { %v850_v25 = vperm.slane %v846_v24, %v849_v22 }
 0x213   :  { %853 = vst.msk [vmem:[#allocation11] sm:$0x1] %vm852_vm2, %v850_v25 }
 0x214   :  { %864 = dma.vmem_to_hbm [thread:$0]  %s860_s26, 16, %s862_s29, [#allocation5]  }
 0x215   :  { %1027 = dma.done.wait [#allocation5], 16  }
 0x216   :  { %1028 = vsyncadd [#allocation5], 4294967280 }
 0x217   :  { %869 = vsyncpa [#allocation4], 1 }
 0x218   :  { %870 = vsyncpa [#allocation7], 1 }
 0x219   :  { %871 = vsyncpa [#allocation10], 1 }
 0x21a   :  { %872 = vsyncpa [#allocation5], 1 }

</bundles_post_ra>
